<compile_context>
chip_gen: v7x
topology: tpu7x:2x2x1
jax: 0.10.0
libtpu: 0.0.40
codegen_flags: <defaults>
</compile_context>

<pallas_src>
import functools

import jax
import jax.numpy as jnp
from jax.experimental import pallas as pl
from jax.experimental.pallas import tpu as pltpu


def _round_up(x, m):
    return ((x + m - 1) // m) * m


# ----------------------------- Pallas kernel --------------------------------
def mlp_kernel(x_ref, w0_ref, wh_ref, b_ref, o_ref, *, tap_offsets, n_hidden):
    """One batch image per grid step.

    x_ref : (C_in, Lp)            flattened (H*W) image row, zero-padded to Lp
    w0_ref: (kh*kw, C_out, C_in)  first-conv weights, one (C_out, C_in) slab per tap
    wh_ref: (max(n_hidden,1), C_out, C_out)  stacked 1x1 conv weights
    b_ref : (C_out, n_hidden+1)   col 0 = first-conv bias, col h+1 = hidden h bias
    o_ref : (C_out, Mp)           lane-dense activations (channels x extended pixels)
    """
    c_out, mp = o_ref.shape

    # kxk conv via fused im2col: tap (i, j) of output column p reads input
    # column p + i*W + j, i.e. a contiguous lane-shifted slice of the image.
    # Static Python loop -> fully unrolled (kh*kw small dots, accumulated in f32).
    acc = jnp.zeros((c_out, mp), jnp.float32)
    for t, off in enumerate(tap_offsets):
        acc += jnp.dot(w0_ref[t], x_ref[:, pl.ds(off, mp)],
                       preferred_element_type=jnp.float32)
    y = acc + b_ref[:, 0:1]

    # [ReLU -> 1x1 conv] * n_hidden, all lane-dense (C_out, Mp) matmuls.
    for h in range(n_hidden):
        y = jnp.maximum(y, 0.0)
        y = jnp.dot(wh_ref[h], y, preferred_element_type=jnp.float32) \
            + b_ref[:, h + 1:h + 2]

    o_ref[...] = y.astype(o_ref.dtype)


def _dimension_semantics(grid_n):
    """CORE_PARALLEL on 2-TensorCore (v7x-class) chips, plain 'parallel' elsewhere."""
    try:
        kind = jax.devices()[0].device_kind.lower()
    except Exception:
        kind = ""
    if "7" in kind and grid_n % 2 == 0:
        return (pltpu.CORE_PARALLEL,)
    return ("parallel",)


def mlp_pallas(x_pad, w0_taps, wh, bs, *, tap_offsets, n_hidden, mp):
    """x_pad: (N, C_in, Lp) f32. Returns (N, C_out, mp) f32 (extended-pixel layout)."""
    n, c_in, lp = x_pad.shape
    taps, c_out, _ = w0_taps.shape

    flops = 2 * n * mp * (taps * c_out * c_in + n_hidden * c_out * c_out)
    bytes_accessed = 4 * (x_pad.size + w0_taps.size + wh.size + bs.size
                          + n * c_out * mp)

    def resident(a):  # full block, constant index -> stays in VMEM across the grid
        return pl.BlockSpec(a.shape, lambda i: (0,) * a.ndim)

    kernel = functools.partial(mlp_kernel, tap_offsets=tap_offsets,
                               n_hidden=n_hidden)

    return pl.pallas_call(
        kernel,
        out_shape=jax.ShapeDtypeStruct((n, c_out, mp), jnp.float32),
        grid_spec=pltpu.PrefetchScalarGridSpec(
            num_scalar_prefetch=0,
            grid=(n,),
            in_specs=[
                pl.BlockSpec((None, c_in, lp), lambda i: (i, 0, 0)),  # one image/step
                resident(w0_taps),
                resident(wh),
                resident(bs),
            ],
            out_specs=pl.BlockSpec((None, c_out, mp), lambda i: (i, 0, 0)),
        ),
        compiler_params=pltpu.CompilerParams(
            dimension_semantics=_dimension_semantics(n),
            # Per-step footprint is ~30 KiB double-buffered; 8 MiB is generous
            # headroom on every generation (v7x 64 MiB, v5e/v6e 128 MiB physical).
            vmem_limit_bytes=8 * 1024 * 1024,
        ),
        cost_estimate=pl.CostEstimate(flops=flops, transcendentals=0,
                                      bytes_accessed=bytes_accessed),
    )(x_pad, w0_taps, wh, bs)


# ------------------------------ JAX glue -------------------------------------
@functools.partial(jax.jit, static_argnames=("kernel_size", "n_hidden"))
def mlp_kernel_forward(x, params, kernel_size, n_hidden=2):
    """Equivalent of MLPKernel(in_c, out_c, kernel_size, n_hidden).forward(x)."""
    w0, b0 = params[0], params[1]
    hidden = params[2:]
    assert len(hidden) == 2 * n_hidden

    n, c_in, H, W = x.shape
    kh = kw = kernel_size
    c_out = w0.shape[0]
    Ho, Wo = H - kh + 1, W - kw + 1

    # Extended-pixel layout: output column p <-> (oh, ow) = divmod(p, W); columns
    # with ow >= Wo (and p >= Ho*W) are garbage computed from zero padding and are
    # dropped by the epilogue slices below.  For tap (i, j) the input of column p
    # is x_flat[:, p + i*W + j] -> a contiguous, in-bounds lane slice.
    mp = _round_up(Ho * W, 128)                    # lane-dense activation width
    max_off = (kh - 1) * W + (kw - 1)
    lp = _round_up(mp + max_off, 128)              # padded image width (in-bounds slices)

    x_pad = jnp.pad(x.reshape(n, c_in, H * W), ((0, 0), (0, 0), (0, lp - H * W)))

    # First-conv weights as one (C_out, C_in) slab per tap; order matches tap_offsets.
    w0_taps = w0.transpose(2, 3, 0, 1).reshape(kh * kw, c_out, c_in)
    tap_offsets = tuple(i * W + j for i in range(kh) for j in range(kw))

    # Stacked 1x1 weights and packed biases (one small DMA each).
    if n_hidden > 0:
        wh = jnp.stack([hidden[2 * h].reshape(c_out, c_out) for h in range(n_hidden)],
                       axis=0)
        bs = jnp.stack([b0] + [hidden[2 * h + 1] for h in range(n_hidden)], axis=1)
    else:
        wh = jnp.zeros((1, c_out, c_out), x.dtype)  # unused dummy (loop count 0)
        bs = b0[:, None]

    out = mlp_pallas(x_pad, w0_taps, wh, bs,
                     tap_offsets=tap_offsets, n_hidden=n_hidden, mp=mp)

    # Epilogue: tiny slices + metadata-only reshape (no transpose, no relayout).
    y = out[:, :, :Ho * W].reshape(n, c_out, Ho, W)[:, :, :, :Wo]
    return y


def reference_forward(x, params, kernel_size, n_hidden=2):
    """Pure-JAX reference (lax.conv) for the correctness check."""
    w0, b0 = params[0], params[1]
    hidden = params[2:]
    dn = ("NCHW", "OIHW", "NCHW")
    y = jax.lax.conv_general_dilated(x, w0, (1, 1), "VALID",
                                     dimension_numbers=dn) + b0[None, :, None, None]
    for h in range(n_hidden):
        w, b = hidden[2 * h], hidden[2 * h + 1]
        y = jnp.maximum(y, 0.0)
        y = jax.lax.conv_general_dilated(y, w, (1, 1), "VALID",
                                         dimension_numbers=dn) + b[None, :, None, None]
    return y


# ------------------------------- driver --------------------------------------
if __name__ == "__main__":
    # Module config: MLPKernel(in_channels=4, out_channels=8, kernel_size=3, n_hidden=2)
    in_channels, out_channels, kernel_size, n_hidden = 4, 8, 3, 2

    key = jax.random.PRNGKey(0)
    k = jax.random.split(key, 8)

    x = jax.random.normal(k[0], (2, in_channels, 16, 16), dtype=jnp.float32)

    # Deterministic parameter init (shapes match nn.Conv2d weights/biases).
    w0 = jax.random.normal(k[1], (out_channels, in_channels, kernel_size, kernel_size),
                           dtype=jnp.float32) * 0.1
    b0 = jax.random.normal(k[2], (out_channels,), dtype=jnp.float32) * 0.1
    w1 = jax.random.normal(k[3], (out_channels, out_channels, 1, 1), dtype=jnp.float32) * 0.1
    b1 = jax.random.normal(k[4], (out_channels,), dtype=jnp.float32) * 0.1
    w2 = jax.random.normal(k[5], (out_channels, out_channels, 1, 1), dtype=jnp.float32) * 0.1
    b2 = jax.random.normal(k[6], (out_channels,), dtype=jnp.float32) * 0.1
    params = (w0, b0, w1, b1, w2, b2)

    out = mlp_kernel_forward(x, params, kernel_size, n_hidden=n_hidden)
    out = jax.block_until_ready(out)

    ref = reference_forward(x, params, kernel_size, n_hidden=n_hidden)
    assert out.shape == (2, out_channels, 14, 14), out.shape
    assert jnp.allclose(out, ref, atol=1e-4, rtol=1e-4), \
        float(jnp.max(jnp.abs(out - ref)))

    print("KERNEL_OK")
</pallas_src>

<mosaic_0001>
module attributes {stable_mosaic.version = 11 : i64} {
  func.func @mlp_kernel(%arg0: i32, %arg1: memref<1x4x384xf32, #tpu.memory_space<vmem>>, %arg2: memref<9x8x4xf32, #tpu.memory_space<vmem>>, %arg3: memref<2x8x8xf32, #tpu.memory_space<vmem>>, %arg4: memref<8x3xf32, #tpu.memory_space<vmem>>, %arg5: memref<1x8x256xf32, #tpu.memory_space<vmem>>) attributes {dimension_semantics = [#tpu.dimension_semantics<parallel>], iteration_bounds = array<i64: 2>, scalar_prefetch = 0 : i64, scratch_operands = 0 : i64, tpu.core_type = #tpu.core_type<tc>, window_params = [{transform_indices = @transform_0, window_bounds = array<i64: 1, 4, 384>}, {pipeline_mode = #tpu.pipeline_mode<synchronous>, transform_indices = @transform_1, window_bounds = array<i64: 9, 8, 4>}, {pipeline_mode = #tpu.pipeline_mode<synchronous>, transform_indices = @transform_2, window_bounds = array<i64: 2, 8, 8>}, {pipeline_mode = #tpu.pipeline_mode<synchronous>, transform_indices = @transform_3, window_bounds = array<i64: 8, 3>}, {transform_indices = @transform_4, window_bounds = array<i64: 1, 8, 256>}]} {
    %cst = arith.constant 0.000000e+00 : f32
    %0 = vector.broadcast %cst : f32 to vector<8x256xf32>
    %c0 = arith.constant 0 : index
    %c0_0 = arith.constant 0 : index
    %c0_1 = arith.constant 0 : index
    %1 = vector.load %arg2[%c0, %c0_0, %c0_1] : memref<9x8x4xf32, #tpu.memory_space<vmem>>, vector<1x8x4xf32>
    %2 = vector.shape_cast %1 : vector<1x8x4xf32> to vector<8x4xf32>
    %c0_2 = arith.constant 0 : index
    %c0_3 = arith.constant 0 : index
    %c0_4 = arith.constant 0 : index
    %3 = vector.load %arg1[%c0_2, %c0_3, %c0_4] : memref<1x4x384xf32, #tpu.memory_space<vmem>>, vector<1x4x256xf32>
    %4 = vector.shape_cast %3 : vector<1x4x256xf32> to vector<4x256xf32>
    %cst_5 = arith.constant dense<0.000000e+00> : vector<8x256xf32>
    %5 = tpu.matmul %2, %4, %cst_5 {dimension_numbers = #tpu.dot_dimension_numbers<[1], [0], [0], [1], [0, 0, 1, 1], [], []>} : vector<8x4xf32>, vector<4x256xf32>, vector<8x256xf32> -> vector<8x256xf32>
    %6 = arith.addf %0, %5 : vector<8x256xf32>
    %c1 = arith.constant 1 : index
    %c0_6 = arith.constant 0 : index
    %c0_7 = arith.constant 0 : index
    %7 = vector.load %arg2[%c1, %c0_6, %c0_7] : memref<9x8x4xf32, #tpu.memory_space<vmem>>, vector<1x8x4xf32>
    %8 = vector.shape_cast %7 : vector<1x8x4xf32> to vector<8x4xf32>
    %c0_8 = arith.constant 0 : index
    %c0_9 = arith.constant 0 : index
    %c1_10 = arith.constant 1 : index
    %9 = vector.load %arg1[%c0_8, %c0_9, %c1_10] : memref<1x4x384xf32, #tpu.memory_space<vmem>>, vector<1x4x256xf32>
    %10 = vector.shape_cast %9 : vector<1x4x256xf32> to vector<4x256xf32>
    %cst_11 = arith.constant dense<0.000000e+00> : vector<8x256xf32>
    %11 = tpu.matmul %8, %10, %cst_11 {dimension_numbers = #tpu.dot_dimension_numbers<[1], [0], [0], [1], [0, 0, 1, 1], [], []>} : vector<8x4xf32>, vector<4x256xf32>, vector<8x256xf32> -> vector<8x256xf32>
    %12 = arith.addf %6, %11 : vector<8x256xf32>
    %c2 = arith.constant 2 : index
    %c0_12 = arith.constant 0 : index
    %c0_13 = arith.constant 0 : index
    %13 = vector.load %arg2[%c2, %c0_12, %c0_13] : memref<9x8x4xf32, #tpu.memory_space<vmem>>, vector<1x8x4xf32>
    %14 = vector.shape_cast %13 : vector<1x8x4xf32> to vector<8x4xf32>
    %c0_14 = arith.constant 0 : index
    %c0_15 = arith.constant 0 : index
    %c2_16 = arith.constant 2 : index
    %15 = vector.load %arg1[%c0_14, %c0_15, %c2_16] : memref<1x4x384xf32, #tpu.memory_space<vmem>>, vector<1x4x256xf32>
    %16 = vector.shape_cast %15 : vector<1x4x256xf32> to vector<4x256xf32>
    %cst_17 = arith.constant dense<0.000000e+00> : vector<8x256xf32>
    %17 = tpu.matmul %14, %16, %cst_17 {dimension_numbers = #tpu.dot_dimension_numbers<[1], [0], [0], [1], [0, 0, 1, 1], [], []>} : vector<8x4xf32>, vector<4x256xf32>, vector<8x256xf32> -> vector<8x256xf32>
    %18 = arith.addf %12, %17 : vector<8x256xf32>
    %c3 = arith.constant 3 : index
    %c0_18 = arith.constant 0 : index
    %c0_19 = arith.constant 0 : index
    %19 = vector.load %arg2[%c3, %c0_18, %c0_19] : memref<9x8x4xf32, #tpu.memory_space<vmem>>, vector<1x8x4xf32>
    %20 = vector.shape_cast %19 : vector<1x8x4xf32> to vector<8x4xf32>
    %c0_20 = arith.constant 0 : index
    %c0_21 = arith.constant 0 : index
    %c16 = arith.constant 16 : index
    %21 = vector.load %arg1[%c0_20, %c0_21, %c16] : memref<1x4x384xf32, #tpu.memory_space<vmem>>, vector<1x4x256xf32>
    %22 = vector.shape_cast %21 : vector<1x4x256xf32> to vector<4x256xf32>
    %cst_22 = arith.constant dense<0.000000e+00> : vector<8x256xf32>
    %23 = tpu.matmul %20, %22, %cst_22 {dimension_numbers = #tpu.dot_dimension_numbers<[1], [0], [0], [1], [0, 0, 1, 1], [], []>} : vector<8x4xf32>, vector<4x256xf32>, vector<8x256xf32> -> vector<8x256xf32>
    %24 = arith.addf %18, %23 : vector<8x256xf32>
    %c4 = arith.constant 4 : index
    %c0_23 = arith.constant 0 : index
    %c0_24 = arith.constant 0 : index
    %25 = vector.load %arg2[%c4, %c0_23, %c0_24] : memref<9x8x4xf32, #tpu.memory_space<vmem>>, vector<1x8x4xf32>
    %26 = vector.shape_cast %25 : vector<1x8x4xf32> to vector<8x4xf32>
    %c0_25 = arith.constant 0 : index
    %c0_26 = arith.constant 0 : index
    %c17 = arith.constant 17 : index
    %27 = vector.load %arg1[%c0_25, %c0_26, %c17] : memref<1x4x384xf32, #tpu.memory_space<vmem>>, vector<1x4x256xf32>
    %28 = vector.shape_cast %27 : vector<1x4x256xf32> to vector<4x256xf32>
    %cst_27 = arith.constant dense<0.000000e+00> : vector<8x256xf32>
    %29 = tpu.matmul %26, %28, %cst_27 {dimension_numbers = #tpu.dot_dimension_numbers<[1], [0], [0], [1], [0, 0, 1, 1], [], []>} : vector<8x4xf32>, vector<4x256xf32>, vector<8x256xf32> -> vector<8x256xf32>
    %30 = arith.addf %24, %29 : vector<8x256xf32>
    %c5 = arith.constant 5 : index
    %c0_28 = arith.constant 0 : index
    %c0_29 = arith.constant 0 : index
    %31 = vector.load %arg2[%c5, %c0_28, %c0_29] : memref<9x8x4xf32, #tpu.memory_space<vmem>>, vector<1x8x4xf32>
    %32 = vector.shape_cast %31 : vector<1x8x4xf32> to vector<8x4xf32>
    %c0_30 = arith.constant 0 : index
    %c0_31 = arith.constant 0 : index
    %c18 = arith.constant 18 : index
    %33 = vector.load %arg1[%c0_30, %c0_31, %c18] : memref<1x4x384xf32, #tpu.memory_space<vmem>>, vector<1x4x256xf32>
    %34 = vector.shape_cast %33 : vector<1x4x256xf32> to vector<4x256xf32>
    %cst_32 = arith.constant dense<0.000000e+00> : vector<8x256xf32>
    %35 = tpu.matmul %32, %34, %cst_32 {dimension_numbers = #tpu.dot_dimension_numbers<[1], [0], [0], [1], [0, 0, 1, 1], [], []>} : vector<8x4xf32>, vector<4x256xf32>, vector<8x256xf32> -> vector<8x256xf32>
    %36 = arith.addf %30, %35 : vector<8x256xf32>
    %c6 = arith.constant 6 : index
    %c0_33 = arith.constant 0 : index
    %c0_34 = arith.constant 0 : index
    %37 = vector.load %arg2[%c6, %c0_33, %c0_34] : memref<9x8x4xf32, #tpu.memory_space<vmem>>, vector<1x8x4xf32>
    %38 = vector.shape_cast %37 : vector<1x8x4xf32> to vector<8x4xf32>
    %c0_35 = arith.constant 0 : index
    %c0_36 = arith.constant 0 : index
    %c32 = arith.constant 32 : index
    %39 = vector.load %arg1[%c0_35, %c0_36, %c32] : memref<1x4x384xf32, #tpu.memory_space<vmem>>, vector<1x4x256xf32>
    %40 = vector.shape_cast %39 : vector<1x4x256xf32> to vector<4x256xf32>
    %cst_37 = arith.constant dense<0.000000e+00> : vector<8x256xf32>
    %41 = tpu.matmul %38, %40, %cst_37 {dimension_numbers = #tpu.dot_dimension_numbers<[1], [0], [0], [1], [0, 0, 1, 1], [], []>} : vector<8x4xf32>, vector<4x256xf32>, vector<8x256xf32> -> vector<8x256xf32>
    %42 = arith.addf %36, %41 : vector<8x256xf32>
    %c7 = arith.constant 7 : index
    %c0_38 = arith.constant 0 : index
    %c0_39 = arith.constant 0 : index
    %43 = vector.load %arg2[%c7, %c0_38, %c0_39] : memref<9x8x4xf32, #tpu.memory_space<vmem>>, vector<1x8x4xf32>
    %44 = vector.shape_cast %43 : vector<1x8x4xf32> to vector<8x4xf32>
    %c0_40 = arith.constant 0 : index
    %c0_41 = arith.constant 0 : index
    %c33 = arith.constant 33 : index
    %45 = vector.load %arg1[%c0_40, %c0_41, %c33] : memref<1x4x384xf32, #tpu.memory_space<vmem>>, vector<1x4x256xf32>
    %46 = vector.shape_cast %45 : vector<1x4x256xf32> to vector<4x256xf32>
    %cst_42 = arith.constant dense<0.000000e+00> : vector<8x256xf32>
    %47 = tpu.matmul %44, %46, %cst_42 {dimension_numbers = #tpu.dot_dimension_numbers<[1], [0], [0], [1], [0, 0, 1, 1], [], []>} : vector<8x4xf32>, vector<4x256xf32>, vector<8x256xf32> -> vector<8x256xf32>
    %48 = arith.addf %42, %47 : vector<8x256xf32>
    %c8 = arith.constant 8 : index
    %c0_43 = arith.constant 0 : index
    %c0_44 = arith.constant 0 : index
    %49 = vector.load %arg2[%c8, %c0_43, %c0_44] : memref<9x8x4xf32, #tpu.memory_space<vmem>>, vector<1x8x4xf32>
    %50 = vector.shape_cast %49 : vector<1x8x4xf32> to vector<8x4xf32>
    %c0_45 = arith.constant 0 : index
    %c0_46 = arith.constant 0 : index
    %c34 = arith.constant 34 : index
    %51 = vector.load %arg1[%c0_45, %c0_46, %c34] : memref<1x4x384xf32, #tpu.memory_space<vmem>>, vector<1x4x256xf32>
    %52 = vector.shape_cast %51 : vector<1x4x256xf32> to vector<4x256xf32>
    %cst_47 = arith.constant dense<0.000000e+00> : vector<8x256xf32>
    %53 = tpu.matmul %50, %52, %cst_47 {dimension_numbers = #tpu.dot_dimension_numbers<[1], [0], [0], [1], [0, 0, 1, 1], [], []>} : vector<8x4xf32>, vector<4x256xf32>, vector<8x256xf32> -> vector<8x256xf32>
    %54 = arith.addf %48, %53 : vector<8x256xf32>
    %c0_48 = arith.constant 0 : index
    %c0_49 = arith.constant 0 : index
    %55 = vector.load %arg4[%c0_48, %c0_49] : memref<8x3xf32, #tpu.memory_space<vmem>>, vector<8x1xf32>
    %56 = vector.broadcast %55 : vector<8x1xf32> to vector<8x256xf32>
    %57 = arith.addf %54, %56 : vector<8x256xf32>
    %cst_50 = arith.constant 0.000000e+00 : f32
    %58 = vector.broadcast %cst_50 : f32 to vector<8x256xf32>
    %59 = arith.maximumf %57, %58 : vector<8x256xf32>
    %c0_51 = arith.constant 0 : index
    %c0_52 = arith.constant 0 : index
    %c0_53 = arith.constant 0 : index
    %60 = vector.load %arg3[%c0_51, %c0_52, %c0_53] : memref<2x8x8xf32, #tpu.memory_space<vmem>>, vector<1x8x8xf32>
    %61 = vector.shape_cast %60 : vector<1x8x8xf32> to vector<8x8xf32>
    %cst_54 = arith.constant dense<0.000000e+00> : vector<8x256xf32>
    %62 = tpu.matmul %61, %59, %cst_54 {dimension_numbers = #tpu.dot_dimension_numbers<[1], [0], [0], [1], [0, 0, 1, 1], [], []>} : vector<8x8xf32>, vector<8x256xf32>, vector<8x256xf32> -> vector<8x256xf32>
    %c0_55 = arith.constant 0 : index
    %c1_56 = arith.constant 1 : index
    %63 = vector.load %arg4[%c0_55, %c1_56] : memref<8x3xf32, #tpu.memory_space<vmem>>, vector<8x1xf32>
    %64 = vector.broadcast %63 : vector<8x1xf32> to vector<8x256xf32>
    %65 = arith.addf %62, %64 : vector<8x256xf32>
    %cst_57 = arith.constant 0.000000e+00 : f32
    %66 = vector.broadcast %cst_57 : f32 to vector<8x256xf32>
    %67 = arith.maximumf %65, %66 : vector<8x256xf32>
    %c1_58 = arith.constant 1 : index
    %c0_59 = arith.constant 0 : index
    %c0_60 = arith.constant 0 : index
    %68 = vector.load %arg3[%c1_58, %c0_59, %c0_60] : memref<2x8x8xf32, #tpu.memory_space<vmem>>, vector<1x8x8xf32>
    %69 = vector.shape_cast %68 : vector<1x8x8xf32> to vector<8x8xf32>
    %cst_61 = arith.constant dense<0.000000e+00> : vector<8x256xf32>
    %70 = tpu.matmul %69, %67, %cst_61 {dimension_numbers = #tpu.dot_dimension_numbers<[1], [0], [0], [1], [0, 0, 1, 1], [], []>} : vector<8x8xf32>, vector<8x256xf32>, vector<8x256xf32> -> vector<8x256xf32>
    %c0_62 = arith.constant 0 : index
    %c2_63 = arith.constant 2 : index
    %71 = vector.load %arg4[%c0_62, %c2_63] : memref<8x3xf32, #tpu.memory_space<vmem>>, vector<8x1xf32>
    %72 = vector.broadcast %71 : vector<8x1xf32> to vector<8x256xf32>
    %73 = arith.addf %70, %72 : vector<8x256xf32>
    %c0_64 = arith.constant 0 : index
    %c0_65 = arith.constant 0 : index
    %c0_66 = arith.constant 0 : index
    %74 = vector.load %arg5[%c0_64, %c0_65, %c0_66] : memref<1x8x256xf32, #tpu.memory_space<vmem>>, vector<1x8x256xf32>
    %75 = vector.shape_cast %74 : vector<1x8x256xf32> to vector<8x256xf32>
    %76 = vector.shape_cast %73 : vector<8x256xf32> to vector<1x8x256xf32>
    tpu.vector_store %arg5[%c0_64, %c0_65, %c0_66], %76 {strides = array<i32>} : memref<1x8x256xf32, #tpu.memory_space<vmem>>, vector<1x8x256xf32>,
    return
  }
  func.func @transform_0(%arg0: i32) -> (i32, i32, i32) {
    %c0_i32 = arith.constant 0 : i32
    %c0_i32_0 = arith.constant 0 : i32
    %c0_i32_1 = arith.constant 0 : i32
    return %arg0, %c0_i32, %c0_i32_0 : i32, i32, i32
  }
  func.func @transform_1(%arg0: i32) -> (i32, i32, i32) {
    %c0_i32 = arith.constant 0 : i32
    %c0_i32_0 = arith.constant 0 : i32
    %c0_i32_1 = arith.constant 0 : i32
    %c0_i32_2 = arith.constant 0 : i32
    return %c0_i32, %c0_i32_0, %c0_i32_1 : i32, i32, i32
  }
  func.func @transform_2(%arg0: i32) -> (i32, i32, i32) {
    %c0_i32 = arith.constant 0 : i32
    %c0_i32_0 = arith.constant 0 : i32
    %c0_i32_1 = arith.constant 0 : i32
    %c0_i32_2 = arith.constant 0 : i32
    return %c0_i32, %c0_i32_0, %c0_i32_1 : i32, i32, i32
  }
  func.func @transform_3(%arg0: i32) -> (i32, i32) {
    %c0_i32 = arith.constant 0 : i32
    %c0_i32_0 = arith.constant 0 : i32
    %c0_i32_1 = arith.constant 0 : i32
    return %c0_i32, %c0_i32_0 : i32, i32
  }
  func.func @transform_4(%arg0: i32) -> (i32, i32, i32) {
    %c0_i32 = arith.constant 0 : i32
    %c0_i32_0 = arith.constant 0 : i32
    %c0_i32_1 = arith.constant 0 : i32
    return %arg0, %c0_i32, %c0_i32_0 : i32, i32, i32
  }
}

</mosaic_0001>

<bundles_post_ra>
// kernel: mlp_kernel_forward.1
= control target key start
LH: loop header
LB: loop body
LE: loop exit
PB: predicated region body
PF: predicated region fallthrough
CT: control target
= control target key end

     0   :  { %s1413_s15 = smov 0   ;;  %s1552_s0 = inlined_call_operand.vmem [shape: f32[2,4,384], index: 0, kind: input, shape index: {}]   ;;  %s1553_s1 = inlined_call_operand.vmem [shape: f32[9,8,4], index: 1, kind: input, shape index: {}]   ;;  %s1554_s2 = inlined_call_operand.vmem [shape: f32[2,8,8], index: 2, kind: input, shape index: {}]   ;;  %s1555_s3 = inlined_call_operand.vmem [shape: f32[8,3], index: 3, kind: input, shape index: {}]   ;;  %s1556_s4 = inlined_call_operand.vmem [shape: f32[2,8,256], index: 4, kind: output, shape index: {}]  }
   0x1 LB: > { %s1277_s16 = sadd.s32 4294967295, %s1374_s15   ;;  %p1281_p0 = scmp.ge.s32.totalorder %s1374_s15, 1  ;;  %s1374_s15 = sphi %s1413_s15, %s14_s15  }
   0x2   : > { %p162_p1 = scmp.lt.s32.totalorder %s1374_s15, 3 }
   0x4   : > { %p163_p2 = pnand %p1281_p0, %p162_p1 }
   0x5   : > { %p188_p3 = scmp.lt.s32.totalorder (!%p163_p2), %s1277_s16, 1  ;;  %v1376_v0 = vmov (!%p163_p2), 0.0   ;;  %s1377_s21 = smov (!%p163_p2), 112   ;;  %v1384_v11 = vmov (!%p163_p2), 0   ;;  %v1465_v12 = vld [vmem:[%s1555_s3] sm:$0xff] (!%p163_p2)  ;;  %vm220_vm0 = vcmask (!%p163_p2), 1043456  }
   0x6   : > { %166 = sbr.rel (%p163_p2) target bundleno = 838 (0x346), region = 36  ;;  %559 = vmatprep.mubr.f32.mxu0 (!%p163_p2), %v1376_v0  ;;  %289 = vmatprep.mubr.f32.mxu1 (!%p163_p2), %v1376_v0  ;;  %s1378_s22 = smov (!%p163_p2), 111   ;;  %vm485_vm1 = vcmask (!%p163_p2), 916480   ;;  %vm216_vm2 = vcmask (!%p163_p2), 31744   ;;  %v1296_v18 = vld [vmem:[%s1553_s1 + $0x18] sm:$0xff] (!%p163_p2)  ;;  %vm581_vm3 = vcmask (!%p163_p2), 908288  }
   0x7   : > { %s1379_s23 = smov (!%p163_p2), 110   ;;  %s1380_s24 = smov (!%p163_p2), 127   ;;  %1363 = vset.pattern.permute.xlu0 (!%p163_p2), %v1384_v11  ;;  %vm677_vm4 = vcmask (!%p163_p2), 900096   ;;  %v1300_v27 = vld [vmem:[%s1553_s1 + $0x20] sm:$0xff] (!%p163_p2)  ;;  %vm213_vm5 = vcmask (!%p163_p2), 1039360   ;;  %v1304_v34 = vld [vmem:[%s1553_s1 + $0x28] sm:$0xff] (!%p163_p2) }
   0x8   : > { %s1381_s25 = smov (!%p163_p2), 96   ;;  %s1382_s26 = smov (!%p163_p2), 95   ;;  %vm773_vm6 = vcmask (!%p163_p2), 785408   ;;  %v1285_v36 = vld [vmem:[%s1553_s1 + $0x8] sm:$0xff] (!%p163_p2)  ;;  %v1308_v43 = vld [vmem:[%s1553_s1 + $0x30] sm:$0xff] (!%p163_p2)  ;;  %v198_v45 = vld [vmem:[%s1553_s1] sm:$0xff] (!%p163_p2) }
   0x9   : > { %s1383_s27 = smov (!%p163_p2), 126   ;;  %s1385_s28 = smov (!%p163_p2), 94   ;;  %vm869_vm7 = vcmask (!%p163_p2), 777216   ;;  %vm389_vm8 = vcmask (!%p163_p2), 1031168   ;;  %v1312_v52 = vld [vmem:[%s1553_s1 + $0x38] sm:$0xff] (!%p163_p2)  ;;  %vm965_vm9 = vcmask (!%p163_p2), 769024  }
   0xa   : > { %v1292_v59 = vld [vmem:[%s1553_s1 + $0x10] sm:$0xff] (!%p163_p2)  ;;  %v1316_v61 = vld [vmem:[%s1553_s1 + $0x40] sm:$0xff] (!%p163_p2)  ;;  %v1386_v62 = vmov (!%p163_p2), 1   ;;  %vm1063_vm10 = vcmask (!%p163_p2), 64512  }
   0xb   : > { %1364 = vset.pattern.permute.xlu1 (!%p163_p2), %v1386_v62  ;;  %v1058_v11 = vld [vmem:[%s1554_s2] sm:$0xff] (!%p163_p2) }
   0xd   : > { %s1558_s16 = smov (!%p188_p3, %s1277_s16), 1 }
   0xe   : > { %s1342_s17 = smul.u32 12, %s1558_s16  ;;  %s1325_s29 = sshll.u32 %s1558_s16, 4 }
   0xf   : > { %s197_s6 = scalar_lea.vmem %s1556_s4, %s1325_s29 }
  0x10   : > { %s1429_s20 = scalar_lea.vmem %s1552_s0, %s1342_s17 }
  0x11   : > { %v1432_v1 = vld [vmem:[%s1429_s20] sm:$0xff]  ;;  %v475_v3 = vld [vmem:[%s1429_s20 + $0x8] sm:$0xf] }
  0x12   : > { %479 = vrot.lane.b32.xlu1 %v1432_v1, %s1377_s21  ;;  %v1437_v2 = vcombine.high %v1432_v1, %v1432_v1  ;;  %v571_v4 = vld [vmem:[%s1429_s20 + $0x8] sm:$0xf] }
  0x13   : > { %v667_v5 = vld [vmem:[%s1429_s20 + $0x8] sm:$0xf] }
  0x14   : > { %481 = vrot.lane.b32.xlu0 %v1437_v2, %s1377_s21  ;;  %v203_v6 = vld [vmem:[%s1429_s20 + $0x8] sm:$0xf] }
  0x15   : > { %v763_v7 = vld [vmem:[%s1429_s20 + $0x8] sm:$0xf] }
  0x16   : > { %575 = vrot.lane.b32.xlu1 %v1432_v1, %s1378_s22  ;;  %v859_v8 = vld [vmem:[%s1429_s20 + $0x8] sm:$0xf] }
  0x17   : > { %v379_v9 = vld [vmem:[%s1429_s20 + $0x8] sm:$0xf] }
  0x18   : > { %483 = vrot.lane.b32.xlu0 %v475_v3, %s1377_s21  ;;  %v955_v10 = vld [vmem:[%s1429_s20 + $0x8] sm:$0xf] }
  0x1a   : > { %577 = vrot.lane.b32.xlu1 %v1437_v2, %s1378_s22 }
  0x1c   : > { %579 = vrot.lane.b32.xlu0 %v571_v4, %s1378_s22 }
  0x1e   : > { %675 = vrot.lane.b32.xlu1 %v667_v5, %s1379_s23 }
  0x20   : > { %673 = vrot.lane.b32.xlu0 %v1437_v2, %s1379_s23 }
  0x22   : > { %209 = vrot.lane.b32.xlu1 %v1437_v2, %s1380_s24 }
  0x24   : > { %671 = vrot.lane.b32.xlu0 %v1432_v1, %s1379_s23 }
  0x26   : > { %769 = vrot.lane.b32.xlu1 %v1437_v2, %s1381_s25 }
  0x28   : > { %211 = vrot.lane.b32.xlu0 %v203_v6, %s1380_s24 }
  0x2a   : > { %207 = vrot.lane.b32.xlu1 %v1432_v1, %s1380_s24 }
  0x2c   : > { %771 = vrot.lane.b32.xlu0 %v763_v7, %s1381_s25 }
  0x2e   : > { %865 = vrot.lane.b32.xlu1 %v1437_v2, %s1382_s26 }
  0x30   : > { %767 = vrot.lane.b32.xlu0 %v1432_v1, %s1381_s25 }
  0x32   : > { %863 = vrot.lane.b32.xlu1 %v1432_v1, %s1382_s26 }
  0x34   : > { %867 = vrot.lane.b32.xlu0 %v859_v8, %s1382_s26 }
  0x36   : > { %387 = vrot.lane.b32.xlu1 %v379_v9, %s1383_s27 }
  0x38   : > { %385 = vrot.lane.b32.xlu0 %v1437_v2, %s1383_s27 }
  0x3a   : > { %963 = vrot.lane.b32.xlu1 %v955_v10, %s1385_s28 }
  0x3c   : > { %961 = vrot.lane.b32.xlu0 %v1437_v2, %s1385_s28 }
  0x3e   : > { %959 = vrot.lane.b32.xlu1 %v1432_v1, %s1385_s28 }
  0x40   : > { %383 = vrot.lane.b32.xlu0 %v1432_v1, %s1383_s27 }
  0x42   : > { %1060 = vperm.xlu1 %1364, %v1465_v12  }
  0x44   : > { %1051 = vperm.xlu0 %1363, %v1465_v12  }
  0x84   : > { %v480_v13 = vpop.permute.xlu1 %479 }
  0x86   : > { %v482_v14 = vpop.permute.xlu0 %481 }
  0x87   : > { %v486_v20 = vsel %vm485_vm1, %v480_v13, %v482_v14  ;;  %v1387_v13 = vmov 2  }
  0x88   : > { %v576_v15 = vpop.permute.xlu1 %575  ;;  %1365 = vset.pattern.permute.xlu1 %v1387_v13  ;;  %1366 = vset.pattern.permute.xlu0 %v1387_v13 }
  0x89   : > { %1143 = vperm.xlu1 %1365, %v1465_v12  }
  0x8a   : > { %v484_v16 = vpop.permute.xlu0 %483 }
  0x8b   : > { %v487_v17 = vsel %vm485_vm1, %v482_v14, %v484_v16 }
  0x8c   : > { %v578_v19 = vpop.permute.xlu1 %577  ;;  %1297 = vmatprep.subr.msk.mxu0 %vm220_vm0, %v487_v17 }
  0x8d   : > { %1298 = vmatpush1.msk.msra.mxu0 %vm220_vm0, %v486_v20  ;;  %v582_v23 = vsel %vm581_vm3, %v576_v15, %v578_v19 }
  0x8e   : > { %1299 = vmatmul.mubr.msk.f32.vlgmr.msra.gmra.mrb[0].mxu0 %vm216_vm2, %v1296_v18  ;;  %v580_v21 = vpop.permute.xlu0 %579 }
  0x8f   : > { %v583_v22 = vsel %vm581_vm3, %v578_v19, %v580_v21  ;;  %655 = vmatprep.mubr.f32.mxu0 %v1376_v0  ;;  %v1321_v21 = vld [vmem:[%s1554_s2 + $0x8] sm:$0xff] }
  0x90   : > { %v676_v24 = vpop.permute.xlu1 %675  ;;  %1301 = vmatprep.subr.msk.mxu0 %vm220_vm0, %v583_v22 }
  0x91   : > { %1302 = vmatpush1.msk.msra.mxu0 %vm220_vm0, %v582_v23 }
  0x92   : > { %v674_v25 = vpop.permute.xlu0 %673 }
  0x93   : > { %v679_v26 = vsel %vm677_vm4, %v674_v25, %v676_v24 }
  0x94   : > { %1305 = vmatprep.subr.msk.mxu0 %vm220_vm0, %v679_v26  ;;  %v210_v28 = vpop.permute.xlu1 %209 }
  0x96   : > { %1303 = vmatmul.mubr.msk.f32.vlgmr.msra.gmra.mrb[0].mxu0 %vm216_vm2, %v1300_v27  ;;  %v672_v29 = vpop.permute.xlu0 %671 }
  0x97   : > { %v678_v30 = vsel %vm677_vm4, %v672_v29, %v674_v25  ;;  %751 = vmatprep.mubr.f32.mxu0 %v1376_v0 }
  0x98   : > { %1306 = vmatpush1.msk.msra.mxu0 %vm220_vm0, %v678_v30  ;;  %v770_v31 = vpop.permute.xlu1 %769 }
  0x9a   : > { %v212_v32 = vpop.permute.xlu0 %211 }
  0x9b   : > { %v215_v33 = vsel %vm213_vm5, %v210_v28, %v212_v32 }
  0x9c   : > { %1286 = vmatprep.subr.msk.mxu1 %vm220_vm0, %v215_v33  ;;  %v208_v35 = vpop.permute.xlu1 %207 }
  0x9d   : > { %v214_v37 = vsel %vm213_vm5, %v208_v35, %v210_v28 }
  0x9e   : > { %1307 = vmatmul.mubr.msk.f32.vlgmr.msra.gmra.mrb[0].mxu0 %vm216_vm2, %v1304_v34  ;;  %v772_v38 = vpop.permute.xlu0 %771  ;;  %1287 = vmatpush1.msk.msra.mxu1 %vm220_vm0, %v214_v37 }
  0x9f   : > { %v775_v39 = vsel %vm773_vm6, %v770_v31, %v772_v38  ;;  %1288 = vmatmul.mubr.msk.f32.vlgmr.msra.gmra.mrb[0].mxu1 %vm216_vm2, %v1285_v36  ;;  %847 = vmatprep.mubr.f32.mxu0 %v1376_v0 }
  0xa0   : > { %1309 = vmatprep.subr.msk.mxu0 %vm220_vm0, %v775_v39  ;;  %v866_v40 = vpop.permute.xlu1 %865  ;;  %1289 = vmatprep.subr.msk.mxu1 %vm220_vm0, %v1437_v2 }
  0xa1   : > { %1290 = vmatpush1.msk.msra.mxu1 %vm220_vm0, %v1432_v1  ;;  %369 = vmatprep.mubr.f32.mxu1 %v1376_v0 }
  0xa2   : > { %v768_v41 = vpop.permute.xlu0 %767 }
  0xa3   : > { %v774_v42 = vsel %vm773_vm6, %v768_v41, %v770_v31 }
  0xa4   : > { %1310 = vmatpush1.msk.msra.mxu0 %vm220_vm0, %v774_v42  ;;  %v864_v44 = vpop.permute.xlu1 %863 }
  0xa5   : > { %v870_v48 = vsel %vm869_vm7, %v864_v44, %v866_v40 }
  0xa6   : > { %v868_v46 = vpop.permute.xlu0 %867  ;;  %1311 = vmatmul.mubr.msk.f32.vlgmr.msra.gmra.mrb[0].mxu0 %vm216_vm2, %v1308_v43 }
  0xa7   : > { %v871_v47 = vsel %vm869_vm7, %v866_v40, %v868_v46  ;;  %1291 = vmatmul.mubr.msk.f32.vlgmr.msra.gmra.mrb[0].mxu1 %vm216_vm2, %v198_v45  ;;  %943 = vmatprep.mubr.f32.mxu0 %v1376_v0 }
  0xa8   : > { %1313 = vmatprep.subr.msk.mxu0 %vm220_vm0, %v871_v47  ;;  %v388_v49 = vpop.permute.xlu1 %387  ;;  %463 = vmatprep.mubr.f32.mxu1 %v1376_v0 }
  0xa9   : > { %1314 = vmatpush1.msk.msra.mxu0 %vm220_vm0, %v870_v48 }
  0xaa   : > { %v386_v50 = vpop.permute.xlu0 %385 }
  0xab   : > { %v391_v51 = vsel %vm389_vm8, %v386_v50, %v388_v49 }
  0xac   : > { %v964_v53 = vpop.permute.xlu1 %963  ;;  %1293 = vmatprep.subr.msk.mxu1 %vm220_vm0, %v391_v51 }
  0xae   : > { %v962_v54 = vpop.permute.xlu0 %961  ;;  %1315 = vmatmul.mubr.msk.f32.vlgmr.msra.gmra.mrb[0].mxu0 %vm216_vm2, %v1312_v52 }
  0xaf   : > { %v967_v55 = vsel %vm965_vm9, %v962_v54, %v964_v53  ;;  %1039 = vmatprep.mubr.f32.mxu0 %v1376_v0 }
  0xb0   : > { %1317 = vmatprep.subr.msk.mxu0 %vm220_vm0, %v967_v55  ;;  %v960_v56 = vpop.permute.xlu1 %959 }
  0xb1   : > { %v966_v57 = vsel %vm965_vm9, %v960_v56, %v962_v54 }
  0xb2   : > { %v384_v58 = vpop.permute.xlu0 %383  ;;  %1318 = vmatpush1.msk.msra.mxu0 %vm220_vm0, %v966_v57 }
  0xb3   : > { %v390_v60 = vsel %vm389_vm8, %v384_v58, %v386_v50 }
  0xb4   : > { %1294 = vmatpush1.msk.msra.mxu1 %vm220_vm0, %v390_v60 }
  0xb5   : > { %1295 = vmatmul.mubr.msk.f32.vlgmr.msra.gmra.mrb[0].mxu1 %vm216_vm2, %v1292_v59 }
  0xb6   : > { %1319 = vmatmul.mubr.msk.f32.vlgmr.msra.gmra.mrb[0].mxu0 %vm216_vm2, %v1316_v61  ;;  %1131 = vmatprep.mubr.f32.mxu1 %v1376_v0 }
  0xc1   : > { %v1061_v14 = vpop.permute.xlu1 %1060 }
  0xc3   : > { %v1052_v1 = vpop.permute.xlu0 %1051 }
 0x188   : > { %v465_v63 = vpop.f32.mrb[0].mxu1 }
 0x189   : > { %v467_v2 = vpop.f32.mrb[1].mxu1  ;;  %v1041_v3 = vpop.f32.mrb[0].mxu0 }
 0x18a   : > { %v1326_v4 = vadd.f32 %v1041_v3, %v465_v63  ;;  %v1043_v5 = vpop.f32.mrb[1].mxu0 }
 0x18b   : > { %v1327_v6 = vadd.f32 %v1043_v5, %v467_v2 }
 0x18c   : > { %v1054_v7 = vadd.f32 %v1326_v4, %v1052_v1 }
 0x18d   : > { %v1055_v8 = vadd.f32 %v1327_v6, %v1052_v1 }
 0x18e   : > { %v1056_v10 = vmax.f32 %v1054_v7, 0.0 }
 0x18f   : > { %v1057_v9 = vmax.f32 %v1055_v8, 0.0 }
 0x191   : > { %1067 = vmatprep.subr.mxu1 %v1057_v9 }
 0x192   : > { %1068 = vmatpush1.msra.mxu1 %v1056_v10 }
 0x193   : > { %1320 = vmatmul.mubr.msk.f32.vlgmr.msra.gmra.mrb[2].mxu1 %vm1063_vm10, %v1058_v11 }
 0x194   : > { %1213 = vmatprep.mubr.f32.mxu1 %v1376_v0  ;;  %v1144_v0 = vpop.permute.xlu1 %1143 }
 0x266   : > { %v1133_v15 = vpop.f32.mrb[2].mxu1 }
 0x267   : > { %v1134_v16 = vadd.f32 %v1133_v15, %v1061_v14  ;;  %v1135_v17 = vpop.f32.mrb[3].mxu1 }
 0x268   : > { %v1136_v18 = vadd.f32 %v1135_v17, %v1061_v14 }
 0x269   : > { %v1138_v20 = vmax.f32 %v1134_v16, 0.0 }
 0x26a   : > { %v1139_v19 = vmax.f32 %v1136_v18, 0.0 }
 0x26c   : > { %1149 = vmatprep.subr.mxu1 %v1139_v19 }
 0x26d   : > { %1150 = vmatpush1.msra.mxu1 %v1138_v20 }
 0x26e   : > { %1322 = vmatmul.mubr.msk.f32.vlgmr.msra.gmra.mrb[4].mxu1 %vm1063_vm10, %v1321_v21 }
 0x341   : > { %v1215_v22 = vpop.f32.mrb[4].mxu1 }
 0x342   : > { %v1216_v12 = vadd.f32 %v1215_v22, %v1144_v0  ;;  %v1217_v23 = vpop.f32.mrb[5].mxu1 }
 0x343   : > { %v1218_v24 = vadd.f32 %v1217_v23, %v1144_v0 }
 0x344   : > { %1220 = vst [vmem:[%s197_s6] sm:$0xff] %v1216_v12 }
 0x345   : > { %1221 = vst [vmem:[%s197_s6 + $0x8] sm:$0xff] %v1218_v24 }
 0x346 PF: > { %s14_s15 = sadd.s32 1, %s1374_s15  }
 0x347   : > { %p11_p4 = scmp.ge.s32.totalorder %s14_s15, 4  }
 0x349   :  { %13 = sbr.rel (!%p11_p4) target bundleno = 1 (0x1), region = 75 }

</bundles_post_ra>
